<compile_context>
chip_gen: v7x
topology: tpu7x:2x2x1
jax: 0.10.0
libtpu: 0.0.40
codegen_flags: <defaults>
</compile_context>

<pallas_src>
import functools
import math

import jax
import jax.numpy as jnp
from jax.experimental import pallas as pl
from jax.experimental.pallas import tpu as pltpu


_LANE = 128           # lane (last-dim) tile width
_MAX_SUBLANES = 1024  # max sublane rows per block -> 1024*128 = 131072 quats/block


def _round_up(x: int, m: int) -> int:
    return ((x + m - 1) // m) * m


def _cdiv(a: int, b: int) -> int:
    return -(-a // b)


def _num_tensorcores() -> int:
    """Best-effort TensorCores-per-chip count (gates the 2-block megacore split)."""
    try:
        kind = jax.devices()[0].device_kind.lower()
    except Exception:
        return 1
    # Single-TensorCore parts: v5e / v6e ("lite" variants).
    if "lite" in kind or "v5e" in kind or "v6e" in kind:
        return 1
    # Dual-TensorCore / megacore parts.
    if any(tag in kind for tag in ("v3", "v4", "v5p", "v5", "7x", "7p")):
        return 2
    return 1


def _quat_to_rotmat_kernel(q_ref, o_ref):
    """q_ref: (4, TS, 128) f32 quat components; o_ref: (9, TS, 128) rotmat rows."""
    r = q_ref[0]
    i = q_ref[1]
    j = q_ref[2]
    k = q_ref[3]

    # Hoist shared products (each appears twice in the 3x3 entries).
    ii = i * i
    jj = j * j
    kk = k * k
    ij = i * j
    ik = i * k
    jk = j * k
    ir = i * r
    jr = j * r
    kr = k * r

    # two_s = 2 / (w^2 + x^2 + y^2 + z^2) == 1 / (0.5 * norm_sq)
    # approx=False keeps 1e-5 parity with the torch reference (exact division).
    half_norm = 0.5 * (r * r + ii + jj + kk)
    two_s = pl.reciprocal(half_norm, approx=False)

    t_ij = two_s * ij
    t_ik = two_s * ik
    t_jk = two_s * jk
    t_ir = two_s * ir
    t_jr = two_s * jr
    t_kr = two_s * kr

    od = o_ref.dtype
    # 9 full (TS, 128) lane-dense unmasked stores.
    o_ref[0] = (1.0 - two_s * (jj + kk)).astype(od)
    o_ref[1] = (t_ij - t_kr).astype(od)
    o_ref[2] = (t_ik + t_jr).astype(od)
    o_ref[3] = (t_ij + t_kr).astype(od)
    o_ref[4] = (1.0 - two_s * (ii + kk)).astype(od)
    o_ref[5] = (t_jk - t_ir).astype(od)
    o_ref[6] = (t_ik - t_jr).astype(od)
    o_ref[7] = (t_jk + t_ir).astype(od)
    o_ref[8] = (1.0 - two_s * (ii + jj)).astype(od)


@functools.partial(jax.jit, static_argnames=("out_dtype",))
def quat_to_rotmat_pallas(quat: jax.Array, out_dtype=jnp.float32) -> jax.Array:
    """Convert quaternions (..., 4) [w, x, y, z] to rotation matrices (..., 3, 3)."""
    if quat.shape[-1] != 4:
        raise ValueError(f"expected last dim 4, got {quat.shape}")
    batch_shape = quat.shape[:-1]
    n = math.prod(batch_shape) if batch_shape else 1

    out_dt = jnp.dtype(out_dtype)
    # Minimum sublane tile for the output dtype: 8 (f32), 16 (bf16), 32 (8-bit).
    sub_min = max(8, 32 // max(out_dt.itemsize, 1))

    # Batch -> (rows, 128) dense tiles; pad rows only to the sublane minimum
    # (<= sub_min*128 - 1 extra quats).  Ragged row count vs the block size is
    # handled by Pallas partial edge blocks.
    n_rows = _cdiv(max(n, 1), _LANE)
    n_rows_pad = _round_up(n_rows, sub_min)
    n_pad = n_rows_pad * _LANE

    # Sublane tile TS: max it out on single-core chips; split into an even
    # number of blocks (>= 2) only when both TensorCores can actually share
    # the grid.
    if n_rows_pad <= sub_min:
        ts = sub_min
    elif _num_tensorcores() >= 2:
        target_blocks = max(2, 2 * _cdiv(n_rows_pad, 2 * _MAX_SUBLANES))
        ts = min(_MAX_SUBLANES, _round_up(_cdiv(n_rows_pad, target_blocks), sub_min))
    else:
        ts = min(_MAX_SUBLANES, n_rows_pad)
    num_blocks = _cdiv(n_rows_pad, ts)

    # (.., 4) -> planar (4, n_pad) f32.  Cast + transpose + tail pad fuse into
    # a single XLA pass; pad value 1.0 keeps padded-lane norms finite (padded
    # lanes are sliced off below and never re-read).
    q = quat.reshape(n, 4).astype(jnp.float32).T
    if n_pad != n:
        q = jnp.pad(q, ((0, 0), (0, n_pad - n)), constant_values=1.0)
    q3 = q.reshape(4, n_rows_pad, _LANE)

    out3 = pl.pallas_call(
        _quat_to_rotmat_kernel,
        out_shape=jax.ShapeDtypeStruct((9, n_rows_pad, _LANE), out_dt),
        grid_spec=pltpu.PrefetchScalarGridSpec(
            num_scalar_prefetch=0,
            grid=(num_blocks,),
            in_specs=[pl.BlockSpec((4, ts, _LANE), lambda b: (0, b, 0))],
            out_specs=pl.BlockSpec((9, ts, _LANE), lambda b: (0, b, 0)),
        ),
        compiler_params=pltpu.CompilerParams(
            dimension_semantics=("parallel",),
            vmem_limit_bytes=32 * 1024 * 1024,  # ~13 MiB used at TS=1024, 2x buffered
        ),
    )(q3)

    # (9, Npad) -> (N, 9) -> (..., 3, 3)   (single fused XLA epilogue pass).
    out = out3.reshape(9, n_pad)[:, :n].T.reshape(batch_shape + (3, 3))
    return out


class RotationConvert:
    """JAX/Pallas port of the PyTorch RotationConvert module (forward only)."""

    def __init__(self, dtype=jnp.float32, rot_mode="rotmat"):
        if rot_mode not in ["rotmat", "rotvec", "quat", "ortho6d"]:
            raise RuntimeError(f"unsupported rot_mode: {rot_mode}")
        self.dtype = dtype
        self.rot_mode = rot_mode
        self.update_rot_fn()

    def update_rot_fn(self):
        if self.rot_mode == "quat":
            self.rot_fn = self.quat_fn
        elif self.rot_mode == "rotvec":
            self.rot_fn = self.rotvec_fn
        elif self.rot_mode == "ortho6d":
            raise NotImplementedError()
        else:
            self.rot_fn = self.identity_fn

    @staticmethod
    def identity_fn(rot, dtype):
        return rot.astype(dtype)

    @staticmethod
    def rotvec_fn(rot, dtype):
        # TODO(synk): rotvec_to_rotmat source was not provided with the module.
        raise NotImplementedError("rotvec_to_rotmat not provided in reference source")

    @staticmethod
    def quat_fn(rot, dtype):
        return quat_to_rotmat_pallas(rot, out_dtype=dtype)

    def __call__(self, rot):
        return self.rot_fn(rot, self.dtype)


def _quat_to_rotmat_ref(quat):
    """Pure-JAX reference matching the PyTorch quat_to_rotmat semantics."""
    r, i, j, k = jnp.moveaxis(quat, -1, 0)
    two_s = 2.0 / jnp.sum(quat * quat, axis=-1)
    o = jnp.stack(
        (
            1 - two_s * (j * j + k * k),
            two_s * (i * j - k * r),
            two_s * (i * k + j * r),
            two_s * (i * j + k * r),
            1 - two_s * (i * i + k * k),
            two_s * (j * k - i * r),
            two_s * (i * k - j * r),
            two_s * (j * k + i * r),
            1 - two_s * (i * i + j * j),
        ),
        axis=-1,
    )
    return o.reshape(quat.shape[:-1] + (3, 3))


if __name__ == "__main__":
    key = jax.random.PRNGKey(0)

    # 'quat' mode: Pallas kernel hot path, small shape (batch=2, joints=8, 4).
    rot = jax.random.normal(key, (2, 8, 4), dtype=jnp.float32) + 0.1
    module_quat = RotationConvert(dtype=jnp.float32, rot_mode="quat")
    out = jax.block_until_ready(module_quat(rot))
    assert out.shape == (2, 8, 3, 3), out.shape
    ref = _quat_to_rotmat_ref(rot)
    assert jnp.allclose(out, ref, atol=1e-5, rtol=1e-5), "quat mismatch vs reference"

    # Second shape: exercises lane padding and the partial-edge-block path.
    rot2 = jax.random.normal(jax.random.PRNGKey(2), (4, 21, 16, 4), jnp.float32) + 0.1
    out2 = jax.block_until_ready(module_quat(rot2))
    assert out2.shape == (4, 21, 16, 3, 3), out2.shape
    ref2 = _quat_to_rotmat_ref(rot2)
    assert jnp.allclose(out2, ref2, atol=1e-5, rtol=1e-5), "quat mismatch (padded case)"

    # 'rotmat' mode: identity path.
    module_id = RotationConvert(dtype=jnp.float32, rot_mode="rotmat")
    rm = jax.random.normal(jax.random.PRNGKey(1), (2, 8, 3, 3), dtype=jnp.float32)
    out_id = jax.block_until_ready(module_id(rm))
    assert jnp.allclose(out_id, rm), "identity path mismatch"

    print("KERNEL_OK")
</pallas_src>

<mosaic_0001>
module attributes {stable_mosaic.version = 11 : i64} {
  func.func @_quat_to_rotmat_kernel(%arg0: i32, %arg1: memref<4x8x128xf32, #tpu.memory_space<vmem>>, %arg2: memref<9x8x128xf32, #tpu.memory_space<vmem>>) attributes {dimension_semantics = [#tpu.dimension_semantics<parallel>], iteration_bounds = array<i64: 1>, scalar_prefetch = 0 : i64, scratch_operands = 0 : i64, tpu.core_type = #tpu.core_type<tc>, window_params = [{transform_indices = @transform_0, window_bounds = array<i64: 4, 8, 128>}, {transform_indices = @transform_1, window_bounds = array<i64: 9, 8, 128>}]} {
    %c0 = arith.constant 0 : index
    %c0_0 = arith.constant 0 : index
    %c0_1 = arith.constant 0 : index
    %0 = vector.load %arg1[%c0, %c0_0, %c0_1] : memref<4x8x128xf32, #tpu.memory_space<vmem>>, vector<1x8x128xf32>
    %1 = vector.shape_cast %0 : vector<1x8x128xf32> to vector<8x128xf32>
    %c1 = arith.constant 1 : index
    %c0_2 = arith.constant 0 : index
    %c0_3 = arith.constant 0 : index
    %2 = vector.load %arg1[%c1, %c0_2, %c0_3] : memref<4x8x128xf32, #tpu.memory_space<vmem>>, vector<1x8x128xf32>
    %3 = vector.shape_cast %2 : vector<1x8x128xf32> to vector<8x128xf32>
    %c2 = arith.constant 2 : index
    %c0_4 = arith.constant 0 : index
    %c0_5 = arith.constant 0 : index
    %4 = vector.load %arg1[%c2, %c0_4, %c0_5] : memref<4x8x128xf32, #tpu.memory_space<vmem>>, vector<1x8x128xf32>
    %5 = vector.shape_cast %4 : vector<1x8x128xf32> to vector<8x128xf32>
    %c3 = arith.constant 3 : index
    %c0_6 = arith.constant 0 : index
    %c0_7 = arith.constant 0 : index
    %6 = vector.load %arg1[%c3, %c0_6, %c0_7] : memref<4x8x128xf32, #tpu.memory_space<vmem>>, vector<1x8x128xf32>
    %7 = vector.shape_cast %6 : vector<1x8x128xf32> to vector<8x128xf32>
    %8 = arith.mulf %3, %3 : vector<8x128xf32>
    %9 = arith.mulf %5, %5 : vector<8x128xf32>
    %10 = arith.mulf %7, %7 : vector<8x128xf32>
    %11 = arith.mulf %3, %5 : vector<8x128xf32>
    %12 = arith.mulf %3, %7 : vector<8x128xf32>
    %13 = arith.mulf %5, %7 : vector<8x128xf32>
    %14 = arith.mulf %3, %1 : vector<8x128xf32>
    %15 = arith.mulf %5, %1 : vector<8x128xf32>
    %16 = arith.mulf %7, %1 : vector<8x128xf32>
    %17 = arith.mulf %1, %1 : vector<8x128xf32>
    %18 = arith.addf %17, %8 : vector<8x128xf32>
    %19 = arith.addf %18, %9 : vector<8x128xf32>
    %20 = arith.addf %19, %10 : vector<8x128xf32>
    %cst = arith.constant 5.000000e-01 : f32
    %21 = vector.broadcast %cst : f32 to vector<8x128xf32>
    %22 = arith.mulf %21, %20 : vector<8x128xf32>
    %23 = tpu.reciprocal %22 : vector<8x128xf32> -> vector<8x128xf32>
    %24 = arith.mulf %23, %11 : vector<8x128xf32>
    %25 = arith.mulf %23, %12 : vector<8x128xf32>
    %26 = arith.mulf %23, %13 : vector<8x128xf32>
    %27 = arith.mulf %23, %14 : vector<8x128xf32>
    %28 = arith.mulf %23, %15 : vector<8x128xf32>
    %29 = arith.mulf %23, %16 : vector<8x128xf32>
    %30 = arith.addf %9, %10 : vector<8x128xf32>
    %31 = arith.mulf %23, %30 : vector<8x128xf32>
    %cst_8 = arith.constant 1.000000e+00 : f32
    %32 = vector.broadcast %cst_8 : f32 to vector<8x128xf32>
    %33 = arith.subf %32, %31 : vector<8x128xf32>
    %c0_9 = arith.constant 0 : index
    %c0_10 = arith.constant 0 : index
    %c0_11 = arith.constant 0 : index
    %34 = vector.load %arg2[%c0_9, %c0_10, %c0_11] : memref<9x8x128xf32, #tpu.memory_space<vmem>>, vector<1x8x128xf32>
    %35 = vector.shape_cast %34 : vector<1x8x128xf32> to vector<8x128xf32>
    %36 = vector.shape_cast %33 : vector<8x128xf32> to vector<1x8x128xf32>
    tpu.vector_store %arg2[%c0_9, %c0_10, %c0_11], %36 {strides = array<i32>} : memref<9x8x128xf32, #tpu.memory_space<vmem>>, vector<1x8x128xf32>,
    %37 = arith.subf %24, %29 : vector<8x128xf32>
    %c1_12 = arith.constant 1 : index
    %c0_13 = arith.constant 0 : index
    %c0_14 = arith.constant 0 : index
    %38 = vector.load %arg2[%c1_12, %c0_13, %c0_14] : memref<9x8x128xf32, #tpu.memory_space<vmem>>, vector<1x8x128xf32>
    %39 = vector.shape_cast %38 : vector<1x8x128xf32> to vector<8x128xf32>
    %40 = vector.shape_cast %37 : vector<8x128xf32> to vector<1x8x128xf32>
    tpu.vector_store %arg2[%c1_12, %c0_13, %c0_14], %40 {strides = array<i32>} : memref<9x8x128xf32, #tpu.memory_space<vmem>>, vector<1x8x128xf32>,
    %41 = arith.addf %25, %28 : vector<8x128xf32>
    %c2_15 = arith.constant 2 : index
    %c0_16 = arith.constant 0 : index
    %c0_17 = arith.constant 0 : index
    %42 = vector.load %arg2[%c2_15, %c0_16, %c0_17] : memref<9x8x128xf32, #tpu.memory_space<vmem>>, vector<1x8x128xf32>
    %43 = vector.shape_cast %42 : vector<1x8x128xf32> to vector<8x128xf32>
    %44 = vector.shape_cast %41 : vector<8x128xf32> to vector<1x8x128xf32>
    tpu.vector_store %arg2[%c2_15, %c0_16, %c0_17], %44 {strides = array<i32>} : memref<9x8x128xf32, #tpu.memory_space<vmem>>, vector<1x8x128xf32>,
    %45 = arith.addf %24, %29 : vector<8x128xf32>
    %c3_18 = arith.constant 3 : index
    %c0_19 = arith.constant 0 : index
    %c0_20 = arith.constant 0 : index
    %46 = vector.load %arg2[%c3_18, %c0_19, %c0_20] : memref<9x8x128xf32, #tpu.memory_space<vmem>>, vector<1x8x128xf32>
    %47 = vector.shape_cast %46 : vector<1x8x128xf32> to vector<8x128xf32>
    %48 = vector.shape_cast %45 : vector<8x128xf32> to vector<1x8x128xf32>
    tpu.vector_store %arg2[%c3_18, %c0_19, %c0_20], %48 {strides = array<i32>} : memref<9x8x128xf32, #tpu.memory_space<vmem>>, vector<1x8x128xf32>,
    %49 = arith.addf %8, %10 : vector<8x128xf32>
    %50 = arith.mulf %23, %49 : vector<8x128xf32>
    %cst_21 = arith.constant 1.000000e+00 : f32
    %51 = vector.broadcast %cst_21 : f32 to vector<8x128xf32>
    %52 = arith.subf %51, %50 : vector<8x128xf32>
    %c4 = arith.constant 4 : index
    %c0_22 = arith.constant 0 : index
    %c0_23 = arith.constant 0 : index
    %53 = vector.load %arg2[%c4, %c0_22, %c0_23] : memref<9x8x128xf32, #tpu.memory_space<vmem>>, vector<1x8x128xf32>
    %54 = vector.shape_cast %53 : vector<1x8x128xf32> to vector<8x128xf32>
    %55 = vector.shape_cast %52 : vector<8x128xf32> to vector<1x8x128xf32>
    tpu.vector_store %arg2[%c4, %c0_22, %c0_23], %55 {strides = array<i32>} : memref<9x8x128xf32, #tpu.memory_space<vmem>>, vector<1x8x128xf32>,
    %56 = arith.subf %26, %27 : vector<8x128xf32>
    %c5 = arith.constant 5 : index
    %c0_24 = arith.constant 0 : index
    %c0_25 = arith.constant 0 : index
    %57 = vector.load %arg2[%c5, %c0_24, %c0_25] : memref<9x8x128xf32, #tpu.memory_space<vmem>>, vector<1x8x128xf32>
    %58 = vector.shape_cast %57 : vector<1x8x128xf32> to vector<8x128xf32>
    %59 = vector.shape_cast %56 : vector<8x128xf32> to vector<1x8x128xf32>
    tpu.vector_store %arg2[%c5, %c0_24, %c0_25], %59 {strides = array<i32>} : memref<9x8x128xf32, #tpu.memory_space<vmem>>, vector<1x8x128xf32>,
    %60 = arith.subf %25, %28 : vector<8x128xf32>
    %c6 = arith.constant 6 : index
    %c0_26 = arith.constant 0 : index
    %c0_27 = arith.constant 0 : index
    %61 = vector.load %arg2[%c6, %c0_26, %c0_27] : memref<9x8x128xf32, #tpu.memory_space<vmem>>, vector<1x8x128xf32>
    %62 = vector.shape_cast %61 : vector<1x8x128xf32> to vector<8x128xf32>
    %63 = vector.shape_cast %60 : vector<8x128xf32> to vector<1x8x128xf32>
    tpu.vector_store %arg2[%c6, %c0_26, %c0_27], %63 {strides = array<i32>} : memref<9x8x128xf32, #tpu.memory_space<vmem>>, vector<1x8x128xf32>,
    %64 = arith.addf %26, %27 : vector<8x128xf32>
    %c7 = arith.constant 7 : index
    %c0_28 = arith.constant 0 : index
    %c0_29 = arith.constant 0 : index
    %65 = vector.load %arg2[%c7, %c0_28, %c0_29] : memref<9x8x128xf32, #tpu.memory_space<vmem>>, vector<1x8x128xf32>
    %66 = vector.shape_cast %65 : vector<1x8x128xf32> to vector<8x128xf32>
    %67 = vector.shape_cast %64 : vector<8x128xf32> to vector<1x8x128xf32>
    tpu.vector_store %arg2[%c7, %c0_28, %c0_29], %67 {strides = array<i32>} : memref<9x8x128xf32, #tpu.memory_space<vmem>>, vector<1x8x128xf32>,
    %68 = arith.addf %8, %9 : vector<8x128xf32>
    %69 = arith.mulf %23, %68 : vector<8x128xf32>
    %cst_30 = arith.constant 1.000000e+00 : f32
    %70 = vector.broadcast %cst_30 : f32 to vector<8x128xf32>
    %71 = arith.subf %70, %69 : vector<8x128xf32>
    %c8 = arith.constant 8 : index
    %c0_31 = arith.constant 0 : index
    %c0_32 = arith.constant 0 : index
    %72 = vector.load %arg2[%c8, %c0_31, %c0_32] : memref<9x8x128xf32, #tpu.memory_space<vmem>>, vector<1x8x128xf32>
    %73 = vector.shape_cast %72 : vector<1x8x128xf32> to vector<8x128xf32>
    %74 = vector.shape_cast %71 : vector<8x128xf32> to vector<1x8x128xf32>
    tpu.vector_store %arg2[%c8, %c0_31, %c0_32], %74 {strides = array<i32>} : memref<9x8x128xf32, #tpu.memory_space<vmem>>, vector<1x8x128xf32>,
    return
  }
  func.func @transform_0(%arg0: i32) -> (i32, i32, i32) {
    %c0_i32 = arith.constant 0 : i32
    %c0_i32_0 = arith.constant 0 : i32
    %c0_i32_1 = arith.constant 0 : i32
    return %c0_i32, %arg0, %c0_i32_0 : i32, i32, i32
  }
  func.func @transform_1(%arg0: i32) -> (i32, i32, i32) {
    %c0_i32 = arith.constant 0 : i32
    %c0_i32_0 = arith.constant 0 : i32
    %c0_i32_1 = arith.constant 0 : i32
    return %c0_i32, %arg0, %c0_i32_0 : i32, i32, i32
  }
}

</mosaic_0001>

<bundles_post_ra>
// kernel: quat_to_rotmat_pallas.1
= control target key start
LH: loop header
LB: loop body
LE: loop exit
PB: predicated region body
PF: predicated region fallthrough
CT: control target
= control target key end

     0   :  { %s134_s0 = inlined_call_operand.vmem [shape: f32[4,8,128], index: 0, kind: input, shape index: {}]   ;;  %s135_s1 = inlined_call_operand.vmem [shape: f32[9,8,128], index: 1, kind: output, shape index: {}]  }
   0x1   :  { %v8_v0 = vld [vmem:[%s134_s0] sm:$0xff]  ;;  %v72_v1 = vld [vmem:[%s134_s0 + $0x8] sm:$0xff]  ;;  %v73_v2 = vld [vmem:[%s134_s0 + $0x10] sm:$0xff] }
   0x2   :  { %v74_v3 = vld [vmem:[%s134_s0 + $0x18] sm:$0xff]  ;;  %v15_v4 = vmul.f32 %v72_v1, %v72_v1  ;;  %v16_v5 = vmul.f32 %v73_v2, %v73_v2  ;;  %v24_v6 = vmul.f32 %v8_v0, %v8_v0  ;;  %v18_v13 = vmul.f32 %v73_v2, %v72_v1 }
   0x3   :  { %v17_v7 = vmul.f32 %v74_v3, %v74_v3  ;;  %v23_v14 = vmul.f32 %v74_v3, %v8_v0  ;;  %v19_v15 = vmul.f32 %v74_v3, %v72_v1  ;;  %v22_v16 = vmul.f32 %v73_v2, %v8_v0 }
   0x4   :  { %v25_v8 = vadd.f32 %v24_v6, %v15_v4  ;;  %v20_v18 = vmul.f32 %v74_v3, %v73_v2  ;;  %v21_v19 = vmul.f32 %v72_v1, %v8_v0  ;;  %v63_v20 = vadd.f32 %v16_v5, %v15_v4 }
   0x5   :  { %v36_v12 = vadd.f32 %v17_v7, %v16_v5  ;;  %v49_v17 = vadd.f32 %v17_v7, %v15_v4 }
   0x6   :  { %v26_v9 = vadd.f32 %v25_v8, %v16_v5 }
   0x8   :  { %v27_v10 = vadd.f32 %v26_v9, %v17_v7 }
   0xa   :  { %v28_v11 = vmul.f32 0.5, %v27_v10 }
   0xc   :  { %83 = vrcp.f32 %v28_v11 }
  0x16   :  { %v84_v21 = vpop.eup %83 }
  0x17   :  { %v37_v22 = vmul.f32 %v84_v21, %v36_v12  ;;  %v30_v23 = vmul.f32 %v84_v21, %v18_v13  ;;  %v35_v24 = vmul.f32 %v84_v21, %v23_v14  ;;  %v31_v25 = vmul.f32 %v84_v21, %v19_v15 }
  0x18   :  { %v34_v26 = vmul.f32 %v84_v21, %v22_v16  ;;  %v50_v27 = vmul.f32 %v84_v21, %v49_v17  ;;  %v32_v28 = vmul.f32 %v84_v21, %v20_v18  ;;  %v33_v29 = vmul.f32 %v84_v21, %v21_v19 }
  0x19   :  { %v38_v30 = vsub.f32 1.0, %v37_v22  ;;  %v40_v31 = vsub.f32 %v30_v23, %v35_v24  ;;  %v46_v32 = vadd.f32 %v35_v24, %v30_v23  ;;  %v64_v33 = vmul.f32 %v84_v21, %v63_v20 }
  0x1a   :  { %v43_v34 = vadd.f32 %v34_v26, %v31_v25  ;;  %v51_v35 = vsub.f32 1.0, %v50_v27  ;;  %v54_v36 = vsub.f32 %v32_v28, %v33_v29  ;;  %v57_v37 = vsub.f32 %v31_v25, %v34_v26 }
  0x1b   :  { %39 = vst [vmem:[%s135_s1] sm:$0xff] %v38_v30  ;;  %75 = vst [vmem:[%s135_s1 + $0x8] sm:$0xff] %v40_v31  ;;  %v60_v38 = vadd.f32 %v33_v29, %v32_v28  ;;  %v65_v39 = vsub.f32 1.0, %v64_v33 }
  0x1c   :  { %77 = vst [vmem:[%s135_s1 + $0x18] sm:$0xff] %v46_v32  ;;  %76 = vst [vmem:[%s135_s1 + $0x10] sm:$0xff] %v43_v34 }
  0x1d   :  { %78 = vst [vmem:[%s135_s1 + $0x20] sm:$0xff] %v51_v35  ;;  %79 = vst [vmem:[%s135_s1 + $0x28] sm:$0xff] %v54_v36 }
  0x1e   :  { %80 = vst [vmem:[%s135_s1 + $0x30] sm:$0xff] %v57_v37  ;;  %81 = vst [vmem:[%s135_s1 + $0x38] sm:$0xff] %v60_v38 }
  0x1f   :  { %82 = vst [vmem:[%s135_s1 + $0x40] sm:$0xff] %v65_v39 }

</bundles_post_ra>
